<compile_context>
chip_gen: v7x
topology: tpu7x:2x2x1
jax: 0.10.0
libtpu: 0.0.40
codegen_flags: <defaults>
</compile_context>

<pallas_src>
import jax
import jax.numpy as jnp
from jax.experimental import pallas as pl
from jax.experimental.pallas import tpu as pltpu

_SMALL_BYTES_THRESHOLD = 1 << 20  # 1 MiB: below this, a kernel launch is pure overhead.


def _dma_copy_kernel(x_hbm_ref, o_hbm_ref, sem):
    # Single HBM->HBM bulk DMA: no VMEM staging, no grid, no per-tile overhead.
    cp = pltpu.make_async_copy(x_hbm_ref, o_hbm_ref, sem)
    cp.start()
    cp.wait()


def _identity_copy(x):
    """Materialized identity copy of x into a distinct buffer via one HBM->HBM DMA."""
    orig_shape = x.shape
    total = int(x.size)

    # Defensive 2D flatten (metadata-only for a contiguous row-major array).
    # The DMA itself is layout-agnostic; this just keeps the HBM refs simple
    # and lane-dense when the element count allows it.
    if total >= 128 and total % 128 == 0:
        view = x.reshape(total // 128, 128)
    else:
        view = x

    out = pl.pallas_call(
        _dma_copy_kernel,
        out_shape=jax.ShapeDtypeStruct(view.shape, view.dtype),
        in_specs=[pl.BlockSpec(memory_space=pl.ANY)],
        out_specs=pl.BlockSpec(memory_space=pl.ANY),
        scratch_shapes=[pltpu.SemaphoreType.DMA(())],
    )(view)
    return out.reshape(orig_shape)


def identity_head_forward(x, y, *, materialize=False, force_kernel=False):
    """Pallas equivalent of IdentityHead.forward(batch) -> (batch.x, batch.y).

    Default (fast) path: pure pass-through, returns the inputs untouched.
    materialize=True: returns a distinct copy of x made by a single HBM->HBM DMA,
    except for tiny inputs (< ~1 MiB) where the launch cost dominates and the
    input is returned as-is unless force_kernel=True.
    y is never routed through a kernel (tiny tensor, pure launch overhead).
    """
    if not materialize:
        return x, y
    nbytes = int(x.size) * jnp.dtype(x.dtype).itemsize
    if nbytes < _SMALL_BYTES_THRESHOLD and not force_kernel:
        return x, y
    return _identity_copy(x), y


if __name__ == "__main__":
    import numpy as np

    key = jax.random.PRNGKey(0)
    kx, ky = jax.random.split(key)

    # small synthetic "batch": x is NCHW features, y is per-example integer labels
    x = jax.random.normal(kx, (2, 4, 16, 16), dtype=jnp.float32)
    y = jax.random.randint(ky, (2,), 0, 10, dtype=jnp.int32)  # labels stay integer

    x_np = np.asarray(x)
    y_np = np.asarray(y)

    # Fast path: true identity, no kernel launch at all.
    x_fast, y_fast = identity_head_forward(x, y)
    assert x_fast is x and y_fast is y

    # Kernel path: exercise the HBM->HBM DMA copy once (force past the small-size bypass).
    x_out, y_out = identity_head_forward(x, y, materialize=True, force_kernel=True)
    jax.block_until_ready((x_out, y_out))

    assert x_out.shape == x_np.shape and x_out.dtype == x_np.dtype
    assert y_out.shape == y_np.shape and y_out.dtype == y_np.dtype
    assert np.array_equal(np.asarray(x_out), x_np)
    assert np.array_equal(np.asarray(y_out), y_np)

    # No aliasing / donation: the original x buffer is still intact and usable.
    assert np.array_equal(np.asarray(x), x_np)

    print("KERNEL_OK")
</pallas_src>

<mosaic_0001>
module attributes {stable_mosaic.version = 11 : i64} {
  func.func @_dma_copy_kernel(%arg0: memref<16x128xf32, #tpu.memory_space<any>>, %arg1: memref<16x128xf32, #tpu.memory_space<any>>, %arg2: memref<!tpu.dma_semaphore, #tpu.memory_space<semaphore_mem>>) attributes {dimension_semantics = [], scalar_prefetch = 0 : i64, scratch_operands = 1 : i64, tpu.core_type = #tpu.core_type<tc>} {
    tpu.enqueue_dma source(%arg0 : memref<16x128xf32, #tpu.memory_space<any>>) target(%arg1 : memref<16x128xf32, #tpu.memory_space<any>>) target_semaphore(%arg2 : memref<!tpu.dma_semaphore, #tpu.memory_space<semaphore_mem>>)
    tpu.wait_dma2 semaphore(%arg2 : memref<!tpu.dma_semaphore, #tpu.memory_space<semaphore_mem>>) src(%arg0 : memref<16x128xf32, #tpu.memory_space<any>>) dst(%arg1 : memref<16x128xf32, #tpu.memory_space<any>>)
    return
  }
}

</mosaic_0001>

<bundles_post_ra>
// kernel: tpu_custom_call.1
= control target key start
LH: loop header
LB: loop body
LE: loop exit
PB: predicated region body
PF: predicated region fallthrough
CT: control target
= control target key end

     0   :  { %s34_s6 = smov [#allocation2]   ;;  %s35_s7 = smov [#allocation3]   ;;  %s53_s0 = inlined_call_operand.hbm [shape: f32[16,128], index: 0, kind: input, shape index: {}]   ;;  %s54_s1 = inlined_call_operand.hbm [shape: f32[16,128], index: 1, kind: output, shape index: {}]  }
   0x1   :  { %s36_s8 = smov 0  }
   0x2   :  { %18 = dma.general %s53_s0, 256, %s54_s1, %s34_s6, %s35_s7, [#allocation4], %s36_s8, 0  }
   0x3   :  { %32 = dma.done.wait [#allocation2], 256 }
   0x4   :  { %33 = vsyncadd [#allocation2], 4294967040 }
   0x5   :  { %22 = vsyncmov [#allocation2] }
   0x8   :  { %s23_s13 = vpop.sfrf %22 }
   0x9   :  { %p28_p0 = scmp.ne.s32.totalorder %s23_s13, 0 }
   0xb   :  { %27 = shalt.err (%p28_p0)  }

</bundles_post_ra>
